<compile_context>
chip_gen: v7x
topology: tpu7x:2x2x1
jax: 0.10.0
libtpu: 0.0.40
codegen_flags: <defaults>
</compile_context>

<pallas_src>
import jax
import jax.numpy as jnp
from jax.experimental import pallas as pl
from jax.experimental.pallas import tpu as pltpu


def _round_up(n, m):
    return -(-n // m) * m


# ---------------------------------------------------------------------------
# Fused kernel
# ---------------------------------------------------------------------------

def _make_fused_kernel(N, H, W, C0, C1):
    HW = H * W
    S = N * HW                      # flattened batch*spatial lane axis
    C0p = _round_up(C0, 8)          # conv1 Cin padded to a sublane multiple
    C1p = _round_up(C1, 8)          # conv2 Cin padded to a sublane multiple
    inv_count = 1.0 / float(S)      # BN population size (all lanes are valid)
    eps = 1e-5

    # Tap t = kh*3 + kw needs input pixel (h+kh-1, w+kw-1) for output (h, w);
    # on the flat image that is index i + d with d = (kh-1)*W + (kw-1), so we
    # roll by (-d) mod S.  Out-of-image (padding) positions are zeroed by the
    # per-tap mask, which also kills any roll wrap-around across image /
    # batch-concatenation boundaries.
    shifts = [(-((kh - 1) * W + (kw - 1))) % S
              for kh in range(3) for kw in range(3)]

    def kernel(x_ref, mask_ref, w1_ref, w2_ref,
               g1_ref, b1_ref, g2_ref, b2_ref, o_ref):
        # x_ref   : (N, C0, H*W)      input, channels-major, spatial on lanes
        # mask_ref: (9, N*H*W)        per-tap validity masks (1.0 = in-image)
        # w1_ref  : (C1, 9*C0p)       packed effective (flipped) conv1 weights
        # w2_ref  : (C1, 9*C1p)       packed effective (flipped) conv2 weights
        # g*/b*   : (C1, 1)           BatchNorm affine parameters
        # o_ref   : (N, C1, H*W)      output

        mask = mask_ref[...]                                 # (9, S)

        def conv3x3(img, w_packed):
            # img: (Cin_pad, S).  Stack the 9 rolled+masked images along the
            # contraction axis (sublane-aligned 8-row blocks) and run ONE MXU
            # matmul of contraction depth 9*Cin_pad.
            blocks = []
            for t, s in enumerate(shifts):
                shifted = img if s == 0 else pltpu.roll(img, s, axis=1)
                blocks.append(shifted * mask[t:t + 1, :])
            rhs = jnp.concatenate(blocks, axis=0)            # (9*Cin_pad, S)
            return jnp.dot(w_packed, rhs,
                           preferred_element_type=jnp.float32)   # (C1, S)
            # (ConvTranspose2d bias omitted: exactly cancelled by the
            #  training-mode BatchNorm that follows.)

        def bn_relu(acc, g, b):
            # Training-mode BatchNorm (biased variance, eps=1e-5) + ReLU,
            # folded into one per-channel FMA over the lane-dense activations.
            mean = jnp.sum(acc, axis=1, keepdims=True) * inv_count
            var = jnp.sum((acc - mean) ** 2, axis=1, keepdims=True) * inv_count
            inv = jax.lax.rsqrt(var + eps)                   # EUP rsqrt
            scale = g * inv                                  # (C1, 1)
            shift = b - mean * scale                         # (C1, 1)
            return jnp.maximum(acc * scale + shift, 0.0)

        # Batch concatenated along the lane axis -> (C0, N*H*W); the 256-lane
        # slices are vreg-aligned so this is a pure relayout, no stores.
        x_flat = jnp.concatenate([x_ref[n] for n in range(N)], axis=1)
        if C0p > C0:
            x_flat = jnp.concatenate(
                [x_flat, jnp.zeros((C0p - C0, S), jnp.float32)], axis=0)

        # ---- conv1 + BN1 + ReLU --------------------------------------------
        acc1 = conv3x3(x_flat, w1_ref[...])                  # (C1, S)
        y1 = bn_relu(acc1, g1_ref[...], b1_ref[...])         # (C1, S)

        # Pad conv2's input channels to 8 sublanes (packed weights are zero on
        # the padded rows) so the tap blocks stay sublane-aligned.
        y1p = y1
        if C1p > C1:
            y1p = jnp.concatenate(
                [y1, jnp.zeros((C1p - C1, S), jnp.float32)], axis=0)

        # ---- conv2 + BN2 + ReLU --------------------------------------------
        acc2 = conv3x3(y1p, w2_ref[...])                     # (C1, S)
        y2 = bn_relu(acc2, g2_ref[...], b2_ref[...])         # (C1, S)

        # Lane-dense, lane-aligned writeback (one (C1, H*W) slab per image).
        for n in range(N):
            o_ref[n] = y2[:, n * HW:(n + 1) * HW]

    return kernel


# ---------------------------------------------------------------------------
# Host-side packing helpers
# ---------------------------------------------------------------------------

def _pack_weights(w, cin_pad):
    """(Cin, Cout, 3, 3) ConvTranspose2d weight -> (Cout, 9*cin_pad).

    Stride-1 / padding-1 ConvTranspose2d == SAME 3x3 correlation with the
    spatially flipped kernel.  Column block t = kh*3 + kw holds the (Cout, Cin)
    tap matrix for input offset (kh-1, kw-1); Cin is zero-padded to cin_pad so
    the stacked RHS blocks are sublane-aligned.
    """
    cin, cout = w.shape[0], w.shape[1]
    f = jnp.flip(w, axis=(2, 3))                  # (Cin, Cout, 3, 3)
    f = jnp.transpose(f, (1, 2, 3, 0))            # (Cout, kh, kw, Cin)
    if cin_pad > cin:
        f = jnp.pad(f, ((0, 0), (0, 0), (0, 0), (0, cin_pad - cin)))
    return f.reshape(cout, 9 * cin_pad)


def _tap_masks(N, H, W):
    """(9, N*H*W) validity mask per tap: 1.0 where the tap reads a real pixel."""
    hs = jnp.arange(H * W) // W
    ws = jnp.arange(H * W) % W
    rows = []
    for kh in range(3):
        for kw in range(3):
            mh = (hs + (kh - 1) >= 0) & (hs + (kh - 1) < H)
            mw = (ws + (kw - 1) >= 0) & (ws + (kw - 1) < W)
            rows.append((mh & mw).astype(jnp.float32))
    return jnp.tile(jnp.stack(rows, axis=0), (1, N))


# ---------------------------------------------------------------------------
# Wrapper
# ---------------------------------------------------------------------------

def unet_decoding_block(x, params):
    """x: (N, F, H, W) float32, NCHW layout (same as the PyTorch module)."""
    N, C0, H, W = x.shape
    C1 = params["w1"].shape[1]
    C0p = _round_up(C0, 8)
    C1p = _round_up(C1, 8)
    HW = H * W

    w1p = _pack_weights(params["w1"], C0p)        # (C1, 9*C0p)
    w2p = _pack_weights(params["w2"], C1p)        # (C1, 9*C1p)
    g1 = params["gamma1"].reshape(C1, 1)
    bt1 = params["beta1"].reshape(C1, 1)
    g2 = params["gamma2"].reshape(C1, 1)
    bt2 = params["beta2"].reshape(C1, 1)
    mask = _tap_masks(N, H, W)
    # params["b1"] / params["b2"] (ConvTranspose biases) are intentionally not
    # passed: training-mode BatchNorm exactly cancels a per-channel bias.

    kernel = _make_fused_kernel(N, H, W, C0, C1)
    out_flat = pl.pallas_call(
        kernel,
        out_shape=jax.ShapeDtypeStruct((N, C1, HW), jnp.float32),
    )(x.reshape(N, C0, HW),   # free bitcast reshape: no transpose, no pad
      mask, w1p, w2p, g1, bt1, g2, bt2)
    return out_flat.reshape(N, C1, H, W)


# ---------------------------------------------------------------------------
# Pure-JAX reference (for correctness check)
# ---------------------------------------------------------------------------

def _ref_conv_t(x_nchw, w_t, b):
    x = jnp.transpose(x_nchw, (0, 2, 3, 1))
    w_eff = jnp.flip(w_t, axis=(2, 3)).transpose(2, 3, 0, 1)   # (3,3,Cin,Cout)
    y = jax.lax.conv_general_dilated(
        x, w_eff, window_strides=(1, 1), padding="SAME",
        dimension_numbers=("NHWC", "HWIO", "NHWC"))
    y = y + b[None, None, None, :]
    return jnp.transpose(y, (0, 3, 1, 2))


def _ref_bn_relu(x, g, b):
    mean = jnp.mean(x, axis=(0, 2, 3), keepdims=True)
    var = jnp.mean((x - mean) ** 2, axis=(0, 2, 3), keepdims=True)
    y = ((x - mean) / jnp.sqrt(var + 1e-5) * g[None, :, None, None]
         + b[None, :, None, None])
    return jnp.maximum(y, 0.0)


def reference(x, p):
    x = _ref_bn_relu(_ref_conv_t(x, p["w1"], p["b1"]), p["gamma1"], p["beta1"])
    x = _ref_bn_relu(_ref_conv_t(x, p["w2"], p["b2"]), p["gamma2"], p["beta2"])
    return x


# ---------------------------------------------------------------------------
# Main
# ---------------------------------------------------------------------------

if __name__ == "__main__":
    features = 8
    N, H, W = 2, 16, 16
    C0, C1 = features, features // 2

    key = jax.random.PRNGKey(0)
    k1, k2, kx = jax.random.split(key, 3)

    # Per _init_weights, every conv / BN bias is zeroed (bias exists, so the
    # kaiming branch never runs); conv weights keep a random init; BN gamma = 1.
    params = {
        "w1": 0.1 * jax.random.normal(k1, (C0, C1, 3, 3), jnp.float32),
        "b1": jnp.zeros((C1,), jnp.float32),
        "gamma1": jnp.ones((C1,), jnp.float32),
        "beta1": jnp.zeros((C1,), jnp.float32),
        "w2": 0.1 * jax.random.normal(k2, (C1, C1, 3, 3), jnp.float32),
        "b2": jnp.zeros((C1,), jnp.float32),
        "gamma2": jnp.ones((C1,), jnp.float32),
        "beta2": jnp.zeros((C1,), jnp.float32),
    }

    x = jax.random.normal(kx, (N, C0, H, W), jnp.float32)   # NCHW, like torch

    out = jax.jit(unet_decoding_block)(x, params)
    out = jax.block_until_ready(out)

    ref = reference(x, params)
    assert out.shape == (N, C1, H, W), out.shape
    err = float(jnp.max(jnp.abs(out - ref)))
    assert jnp.allclose(out, ref, atol=1e-4, rtol=1e-4), err

    print("KERNEL_OK")
</pallas_src>

<mosaic_0001>
module attributes {stable_mosaic.version = 11 : i64} {
  func.func @kernel(%arg0: memref<2x8x256xf32, #tpu.memory_space<vmem>>, %arg1: memref<9x512xf32, #tpu.memory_space<vmem>>, %arg2: memref<4x72xf32, #tpu.memory_space<vmem>>, %arg3: memref<4x72xf32, #tpu.memory_space<vmem>>, %arg4: memref<4x1xf32, #tpu.memory_space<vmem>>, %arg5: memref<4x1xf32, #tpu.memory_space<vmem>>, %arg6: memref<4x1xf32, #tpu.memory_space<vmem>>, %arg7: memref<4x1xf32, #tpu.memory_space<vmem>>, %arg8: memref<2x4x256xf32, #tpu.memory_space<vmem>>) attributes {dimension_semantics = [], scalar_prefetch = 0 : i64, scratch_operands = 0 : i64, tpu.core_type = #tpu.core_type<tc>} {
    %c0 = arith.constant 0 : index
    %c0_0 = arith.constant 0 : index
    %0 = vector.load %arg1[%c0, %c0_0] : memref<9x512xf32, #tpu.memory_space<vmem>>, vector<9x512xf32>
    %c0_1 = arith.constant 0 : index
    %c0_2 = arith.constant 0 : index
    %c0_3 = arith.constant 0 : index
    %1 = vector.load %arg0[%c0_1, %c0_2, %c0_3] : memref<2x8x256xf32, #tpu.memory_space<vmem>>, vector<1x8x256xf32>
    %2 = vector.shape_cast %1 : vector<1x8x256xf32> to vector<8x256xf32>
    %c1 = arith.constant 1 : index
    %c0_4 = arith.constant 0 : index
    %c0_5 = arith.constant 0 : index
    %3 = vector.load %arg0[%c1, %c0_4, %c0_5] : memref<2x8x256xf32, #tpu.memory_space<vmem>>, vector<1x8x256xf32>
    %4 = vector.shape_cast %3 : vector<1x8x256xf32> to vector<8x256xf32>
    %5 = tpu.concatenate %2, %4 in 1 : vector<8x256xf32>, vector<8x256xf32> -> vector<8x512xf32>
    %c0_6 = arith.constant 0 : index
    %c0_7 = arith.constant 0 : index
    %6 = vector.load %arg2[%c0_6, %c0_7] : memref<4x72xf32, #tpu.memory_space<vmem>>, vector<4x72xf32>
    %c17_i32 = arith.constant 17 : i32
    %7 = tpu.dynamic_rotate %5 by %c17_i32 dim 1 : vector<8x512xf32>, i32 -> vector<8x512xf32>
    %8 = vector.extract_strided_slice %0 {offsets = [0, 0], sizes = [1, 512], strides = [1, 1]} : vector<9x512xf32> to vector<1x512xf32>
    %9 = vector.broadcast %8 : vector<1x512xf32> to vector<8x512xf32>
    %10 = arith.mulf %7, %9 : vector<8x512xf32>
    %c16_i32 = arith.constant 16 : i32
    %11 = tpu.dynamic_rotate %5 by %c16_i32 dim 1 : vector<8x512xf32>, i32 -> vector<8x512xf32>
    %12 = vector.extract_strided_slice %0 {offsets = [1, 0], sizes = [1, 512], strides = [1, 1]} : vector<9x512xf32> to vector<1x512xf32>
    %13 = vector.broadcast %12 : vector<1x512xf32> to vector<8x512xf32>
    %14 = arith.mulf %11, %13 : vector<8x512xf32>
    %c15_i32 = arith.constant 15 : i32
    %15 = tpu.dynamic_rotate %5 by %c15_i32 dim 1 : vector<8x512xf32>, i32 -> vector<8x512xf32>
    %16 = vector.extract_strided_slice %0 {offsets = [2, 0], sizes = [1, 512], strides = [1, 1]} : vector<9x512xf32> to vector<1x512xf32>
    %17 = vector.broadcast %16 : vector<1x512xf32> to vector<8x512xf32>
    %18 = arith.mulf %15, %17 : vector<8x512xf32>
    %c1_i32 = arith.constant 1 : i32
    %19 = tpu.dynamic_rotate %5 by %c1_i32 dim 1 : vector<8x512xf32>, i32 -> vector<8x512xf32>
    %20 = vector.extract_strided_slice %0 {offsets = [3, 0], sizes = [1, 512], strides = [1, 1]} : vector<9x512xf32> to vector<1x512xf32>
    %21 = vector.broadcast %20 : vector<1x512xf32> to vector<8x512xf32>
    %22 = arith.mulf %19, %21 : vector<8x512xf32>
    %23 = vector.extract_strided_slice %0 {offsets = [4, 0], sizes = [1, 512], strides = [1, 1]} : vector<9x512xf32> to vector<1x512xf32>
    %24 = vector.broadcast %23 : vector<1x512xf32> to vector<8x512xf32>
    %25 = arith.mulf %5, %24 : vector<8x512xf32>
    %c511_i32 = arith.constant 511 : i32
    %26 = tpu.dynamic_rotate %5 by %c511_i32 dim 1 : vector<8x512xf32>, i32 -> vector<8x512xf32>
    %27 = vector.extract_strided_slice %0 {offsets = [5, 0], sizes = [1, 512], strides = [1, 1]} : vector<9x512xf32> to vector<1x512xf32>
    %28 = vector.broadcast %27 : vector<1x512xf32> to vector<8x512xf32>
    %29 = arith.mulf %26, %28 : vector<8x512xf32>
    %c497_i32 = arith.constant 497 : i32
    %30 = tpu.dynamic_rotate %5 by %c497_i32 dim 1 : vector<8x512xf32>, i32 -> vector<8x512xf32>
    %31 = vector.extract_strided_slice %0 {offsets = [6, 0], sizes = [1, 512], strides = [1, 1]} : vector<9x512xf32> to vector<1x512xf32>
    %32 = vector.broadcast %31 : vector<1x512xf32> to vector<8x512xf32>
    %33 = arith.mulf %30, %32 : vector<8x512xf32>
    %c496_i32 = arith.constant 496 : i32
    %34 = tpu.dynamic_rotate %5 by %c496_i32 dim 1 : vector<8x512xf32>, i32 -> vector<8x512xf32>
    %35 = vector.extract_strided_slice %0 {offsets = [7, 0], sizes = [1, 512], strides = [1, 1]} : vector<9x512xf32> to vector<1x512xf32>
    %36 = vector.broadcast %35 : vector<1x512xf32> to vector<8x512xf32>
    %37 = arith.mulf %34, %36 : vector<8x512xf32>
    %c495_i32 = arith.constant 495 : i32
    %38 = tpu.dynamic_rotate %5 by %c495_i32 dim 1 : vector<8x512xf32>, i32 -> vector<8x512xf32>
    %39 = vector.extract_strided_slice %0 {offsets = [8, 0], sizes = [1, 512], strides = [1, 1]} : vector<9x512xf32> to vector<1x512xf32>
    %40 = vector.broadcast %39 : vector<1x512xf32> to vector<8x512xf32>
    %41 = arith.mulf %38, %40 : vector<8x512xf32>
    %42 = tpu.concatenate %10, %14, %18, %22, %25, %29, %33, %37, %41 in 0 : vector<8x512xf32>, vector<8x512xf32>, vector<8x512xf32>, vector<8x512xf32>, vector<8x512xf32>, vector<8x512xf32>, vector<8x512xf32>, vector<8x512xf32>, vector<8x512xf32> -> vector<72x512xf32>
    %cst = arith.constant dense<0.000000e+00> : vector<4x512xf32>
    %43 = tpu.matmul %6, %42, %cst {dimension_numbers = #tpu.dot_dimension_numbers<[1], [0], [0], [1], [0, 0, 1, 1], [], []>} : vector<4x72xf32>, vector<72x512xf32>, vector<4x512xf32> -> vector<4x512xf32>
    %c0_8 = arith.constant 0 : index
    %c0_9 = arith.constant 0 : index
    %44 = vector.load %arg4[%c0_8, %c0_9] : memref<4x1xf32, #tpu.memory_space<vmem>>, vector<4x1xf32>
    %c0_10 = arith.constant 0 : index
    %c0_11 = arith.constant 0 : index
    %45 = vector.load %arg5[%c0_10, %c0_11] : memref<4x1xf32, #tpu.memory_space<vmem>>, vector<4x1xf32>
    %cst_12 = arith.constant dense<0.000000e+00> : vector<4xf32>
    %46 = vector.multi_reduction <add>, %43, %cst_12 [1] : vector<4x512xf32> to vector<4xf32>
    %47 = vector.shape_cast %46 : vector<4xf32> to vector<4x1xf32>
    %cst_13 = arith.constant 0.001953125 : f32
    %48 = vector.broadcast %cst_13 : f32 to vector<4x1xf32>
    %49 = arith.mulf %47, %48 : vector<4x1xf32>
    %50 = vector.broadcast %49 : vector<4x1xf32> to vector<4x512xf32>
    %51 = arith.subf %43, %50 : vector<4x512xf32>
    %52 = arith.mulf %51, %51 : vector<4x512xf32>
    %cst_14 = arith.constant dense<0.000000e+00> : vector<4xf32>
    %53 = vector.multi_reduction <add>, %52, %cst_14 [1] : vector<4x512xf32> to vector<4xf32>
    %54 = vector.shape_cast %53 : vector<4xf32> to vector<4x1xf32>
    %cst_15 = arith.constant 0.001953125 : f32
    %55 = vector.broadcast %cst_15 : f32 to vector<4x1xf32>
    %56 = arith.mulf %54, %55 : vector<4x1xf32>
    %cst_16 = arith.constant 9.99999974E-6 : f32
    %57 = vector.broadcast %cst_16 : f32 to vector<4x1xf32>
    %58 = arith.addf %56, %57 : vector<4x1xf32>
    %59 = math.rsqrt %58 : vector<4x1xf32>
    %60 = arith.mulf %44, %59 : vector<4x1xf32>
    %61 = arith.mulf %49, %60 : vector<4x1xf32>
    %62 = arith.subf %45, %61 : vector<4x1xf32>
    %63 = vector.broadcast %60 : vector<4x1xf32> to vector<4x512xf32>
    %64 = arith.mulf %43, %63 : vector<4x512xf32>
    %65 = vector.broadcast %62 : vector<4x1xf32> to vector<4x512xf32>
    %66 = arith.addf %64, %65 : vector<4x512xf32>
    %cst_17 = arith.constant 0.000000e+00 : f32
    %67 = vector.broadcast %cst_17 : f32 to vector<4x512xf32>
    %68 = arith.maximumf %66, %67 : vector<4x512xf32>
    %cst_18 = arith.constant 0.000000e+00 : f32
    %69 = vector.broadcast %cst_18 : f32 to vector<4x512xf32>
    %70 = tpu.concatenate %68, %69 in 0 : vector<4x512xf32>, vector<4x512xf32> -> vector<8x512xf32>
    %c0_19 = arith.constant 0 : index
    %c0_20 = arith.constant 0 : index
    %71 = vector.load %arg3[%c0_19, %c0_20] : memref<4x72xf32, #tpu.memory_space<vmem>>, vector<4x72xf32>
    %c17_i32_21 = arith.constant 17 : i32
    %72 = tpu.dynamic_rotate %70 by %c17_i32_21 dim 1 : vector<8x512xf32>, i32 -> vector<8x512xf32>
    %73 = vector.extract_strided_slice %0 {offsets = [0, 0], sizes = [1, 512], strides = [1, 1]} : vector<9x512xf32> to vector<1x512xf32>
    %74 = vector.broadcast %73 : vector<1x512xf32> to vector<8x512xf32>
    %75 = arith.mulf %72, %74 : vector<8x512xf32>
    %c16_i32_22 = arith.constant 16 : i32
    %76 = tpu.dynamic_rotate %70 by %c16_i32_22 dim 1 : vector<8x512xf32>, i32 -> vector<8x512xf32>
    %77 = vector.extract_strided_slice %0 {offsets = [1, 0], sizes = [1, 512], strides = [1, 1]} : vector<9x512xf32> to vector<1x512xf32>
    %78 = vector.broadcast %77 : vector<1x512xf32> to vector<8x512xf32>
    %79 = arith.mulf %76, %78 : vector<8x512xf32>
    %c15_i32_23 = arith.constant 15 : i32
    %80 = tpu.dynamic_rotate %70 by %c15_i32_23 dim 1 : vector<8x512xf32>, i32 -> vector<8x512xf32>
    %81 = vector.extract_strided_slice %0 {offsets = [2, 0], sizes = [1, 512], strides = [1, 1]} : vector<9x512xf32> to vector<1x512xf32>
    %82 = vector.broadcast %81 : vector<1x512xf32> to vector<8x512xf32>
    %83 = arith.mulf %80, %82 : vector<8x512xf32>
    %c1_i32_24 = arith.constant 1 : i32
    %84 = tpu.dynamic_rotate %70 by %c1_i32_24 dim 1 : vector<8x512xf32>, i32 -> vector<8x512xf32>
    %85 = vector.extract_strided_slice %0 {offsets = [3, 0], sizes = [1, 512], strides = [1, 1]} : vector<9x512xf32> to vector<1x512xf32>
    %86 = vector.broadcast %85 : vector<1x512xf32> to vector<8x512xf32>
    %87 = arith.mulf %84, %86 : vector<8x512xf32>
    %88 = vector.extract_strided_slice %0 {offsets = [4, 0], sizes = [1, 512], strides = [1, 1]} : vector<9x512xf32> to vector<1x512xf32>
    %89 = vector.broadcast %88 : vector<1x512xf32> to vector<8x512xf32>
    %90 = arith.mulf %70, %89 : vector<8x512xf32>
    %c511_i32_25 = arith.constant 511 : i32
    %91 = tpu.dynamic_rotate %70 by %c511_i32_25 dim 1 : vector<8x512xf32>, i32 -> vector<8x512xf32>
    %92 = vector.extract_strided_slice %0 {offsets = [5, 0], sizes = [1, 512], strides = [1, 1]} : vector<9x512xf32> to vector<1x512xf32>
    %93 = vector.broadcast %92 : vector<1x512xf32> to vector<8x512xf32>
    %94 = arith.mulf %91, %93 : vector<8x512xf32>
    %c497_i32_26 = arith.constant 497 : i32
    %95 = tpu.dynamic_rotate %70 by %c497_i32_26 dim 1 : vector<8x512xf32>, i32 -> vector<8x512xf32>
    %96 = vector.extract_strided_slice %0 {offsets = [6, 0], sizes = [1, 512], strides = [1, 1]} : vector<9x512xf32> to vector<1x512xf32>
    %97 = vector.broadcast %96 : vector<1x512xf32> to vector<8x512xf32>
    %98 = arith.mulf %95, %97 : vector<8x512xf32>
    %c496_i32_27 = arith.constant 496 : i32
    %99 = tpu.dynamic_rotate %70 by %c496_i32_27 dim 1 : vector<8x512xf32>, i32 -> vector<8x512xf32>
    %100 = vector.extract_strided_slice %0 {offsets = [7, 0], sizes = [1, 512], strides = [1, 1]} : vector<9x512xf32> to vector<1x512xf32>
    %101 = vector.broadcast %100 : vector<1x512xf32> to vector<8x512xf32>
    %102 = arith.mulf %99, %101 : vector<8x512xf32>
    %c495_i32_28 = arith.constant 495 : i32
    %103 = tpu.dynamic_rotate %70 by %c495_i32_28 dim 1 : vector<8x512xf32>, i32 -> vector<8x512xf32>
    %104 = vector.extract_strided_slice %0 {offsets = [8, 0], sizes = [1, 512], strides = [1, 1]} : vector<9x512xf32> to vector<1x512xf32>
    %105 = vector.broadcast %104 : vector<1x512xf32> to vector<8x512xf32>
    %106 = arith.mulf %103, %105 : vector<8x512xf32>
    %107 = tpu.concatenate %75, %79, %83, %87, %90, %94, %98, %102, %106 in 0 : vector<8x512xf32>, vector<8x512xf32>, vector<8x512xf32>, vector<8x512xf32>, vector<8x512xf32>, vector<8x512xf32>, vector<8x512xf32>, vector<8x512xf32>, vector<8x512xf32> -> vector<72x512xf32>
    %cst_29 = arith.constant dense<0.000000e+00> : vector<4x512xf32>
    %108 = tpu.matmul %71, %107, %cst_29 {dimension_numbers = #tpu.dot_dimension_numbers<[1], [0], [0], [1], [0, 0, 1, 1], [], []>} : vector<4x72xf32>, vector<72x512xf32>, vector<4x512xf32> -> vector<4x512xf32>
    %c0_30 = arith.constant 0 : index
    %c0_31 = arith.constant 0 : index
    %109 = vector.load %arg6[%c0_30, %c0_31] : memref<4x1xf32, #tpu.memory_space<vmem>>, vector<4x1xf32>
    %c0_32 = arith.constant 0 : index
    %c0_33 = arith.constant 0 : index
    %110 = vector.load %arg7[%c0_32, %c0_33] : memref<4x1xf32, #tpu.memory_space<vmem>>, vector<4x1xf32>
    %cst_34 = arith.constant dense<0.000000e+00> : vector<4xf32>
    %111 = vector.multi_reduction <add>, %108, %cst_34 [1] : vector<4x512xf32> to vector<4xf32>
    %112 = vector.shape_cast %111 : vector<4xf32> to vector<4x1xf32>
    %cst_35 = arith.constant 0.001953125 : f32
    %113 = vector.broadcast %cst_35 : f32 to vector<4x1xf32>
    %114 = arith.mulf %112, %113 : vector<4x1xf32>
    %115 = vector.broadcast %114 : vector<4x1xf32> to vector<4x512xf32>
    %116 = arith.subf %108, %115 : vector<4x512xf32>
    %117 = arith.mulf %116, %116 : vector<4x512xf32>
    %cst_36 = arith.constant dense<0.000000e+00> : vector<4xf32>
    %118 = vector.multi_reduction <add>, %117, %cst_36 [1] : vector<4x512xf32> to vector<4xf32>
    %119 = vector.shape_cast %118 : vector<4xf32> to vector<4x1xf32>
    %cst_37 = arith.constant 0.001953125 : f32
    %120 = vector.broadcast %cst_37 : f32 to vector<4x1xf32>
    %121 = arith.mulf %119, %120 : vector<4x1xf32>
    %cst_38 = arith.constant 9.99999974E-6 : f32
    %122 = vector.broadcast %cst_38 : f32 to vector<4x1xf32>
    %123 = arith.addf %121, %122 : vector<4x1xf32>
    %124 = math.rsqrt %123 : vector<4x1xf32>
    %125 = arith.mulf %109, %124 : vector<4x1xf32>
    %126 = arith.mulf %114, %125 : vector<4x1xf32>
    %127 = arith.subf %110, %126 : vector<4x1xf32>
    %128 = vector.broadcast %125 : vector<4x1xf32> to vector<4x512xf32>
    %129 = arith.mulf %108, %128 : vector<4x512xf32>
    %130 = vector.broadcast %127 : vector<4x1xf32> to vector<4x512xf32>
    %131 = arith.addf %129, %130 : vector<4x512xf32>
    %cst_39 = arith.constant 0.000000e+00 : f32
    %132 = vector.broadcast %cst_39 : f32 to vector<4x512xf32>
    %133 = arith.maximumf %131, %132 : vector<4x512xf32>
    %134 = vector.extract_strided_slice %133 {offsets = [0, 0], sizes = [4, 256], strides = [1, 1]} : vector<4x512xf32> to vector<4x256xf32>
    %c0_40 = arith.constant 0 : index
    %c0_41 = arith.constant 0 : index
    %c0_42 = arith.constant 0 : index
    %135 = vector.load %arg8[%c0_40, %c0_41, %c0_42] : memref<2x4x256xf32, #tpu.memory_space<vmem>>, vector<1x4x256xf32>
    %136 = vector.shape_cast %135 : vector<1x4x256xf32> to vector<4x256xf32>
    %137 = vector.shape_cast %134 : vector<4x256xf32> to vector<1x4x256xf32>
    tpu.vector_store %arg8[%c0_40, %c0_41, %c0_42], %137 {strides = array<i32>} : memref<2x4x256xf32, #tpu.memory_space<vmem>>, vector<1x4x256xf32>,
    %138 = vector.extract_strided_slice %133 {offsets = [0, 256], sizes = [4, 256], strides = [1, 1]} : vector<4x512xf32> to vector<4x256xf32>
    %c1_43 = arith.constant 1 : index
    %c0_44 = arith.constant 0 : index
    %c0_45 = arith.constant 0 : index
    %139 = vector.load %arg8[%c1_43, %c0_44, %c0_45] : memref<2x4x256xf32, #tpu.memory_space<vmem>>, vector<1x4x256xf32>
    %140 = vector.shape_cast %139 : vector<1x4x256xf32> to vector<4x256xf32>
    %141 = vector.shape_cast %138 : vector<4x256xf32> to vector<1x4x256xf32>
    tpu.vector_store %arg8[%c1_43, %c0_44, %c0_45], %141 {strides = array<i32>} : memref<2x4x256xf32, #tpu.memory_space<vmem>>, vector<1x4x256xf32>,
    return
  }
}

</mosaic_0001>

<bundles_post_ra>
// kernel: unet_decoding_block.1
= control target key start
LH: loop header
LB: loop body
LE: loop exit
PB: predicated region body
PF: predicated region fallthrough
CT: control target
= control target key end

     0   :  { %s978_s29 = smov 16   ;;  %s979_s30 = smov 17   ;;  %v985_v4 = vmov 0.0   ;;  %v51_v5 = vlaneseq  ;;  %vm329_vm8 = vcmask 588800   ;;  %vm477_vm9 = vcmask 1043456   ;;  %s1605_s0 = inlined_call_operand.vmem [shape: f32[2,8,256], index: 0, kind: input, shape index: {}]   ;;  %s1606_s1 = inlined_call_operand.vmem [shape: f32[9,512], index: 1, kind: input, shape index: {}]   ;;  %s1607_s2 = inlined_call_operand.vmem [shape: f32[4,72], index: 2, kind: input, shape index: {}]   ;;  %s1608_s4 = inlined_call_operand.vmem [shape: f32[4,1], index: 4, kind: input, shape index: {}]   ;;  %s1609_s5 = inlined_call_operand.vmem [shape: f32[4,1], index: 5, kind: input, shape index: {}]   ;;  %s1610_s3 = inlined_call_operand.vmem [shape: f32[4,72], index: 3, kind: input, shape index: {}]   ;;  %s1611_s6 = inlined_call_operand.vmem [shape: f32[4,1], index: 6, kind: input, shape index: {}]   ;;  %s1612_s7 = inlined_call_operand.vmem [shape: f32[4,1], index: 7, kind: input, shape index: {}]   ;;  %s1613_s8 = inlined_call_operand.vmem [shape: f32[2,4,256], index: 8, kind: output, shape index: {}]  }
   0x1   :  { %v1036_v0 = vld [vmem:[%s1605_s0] sm:$0xff]  ;;  %v1045_v1 = vld [vmem:[%s1605_s0 + $0x8] sm:$0xff]  ;;  %v1054_v2 = vld [vmem:[%s1605_s0 + $0x18] sm:$0xff]  ;;  %s980_s15 = smov 15   ;;  %s981_s16 = smov 1   ;;  %397 = vmatprep.mubr.f32.mxu0 %v985_v4  ;;  %468 = vmatprep.mubr.f32.mxu1 %v985_v4 }
   0x2   :  { %78 = vrot.lane.b32.xlu1 %v1036_v0, %s978_s29  ;;  %43 = vrot.lane.b32.xlu0 %v1036_v0, %s979_s30  ;;  %v1063_v3 = vld [vmem:[%s1605_s0 + $0x10] sm:$0xff]  ;;  %s982_s0 = smov 127   ;;  %s983_s17 = smov 113   ;;  %v1119_v6 = vshrl.u32 %v51_v5, 7  ;;  %v1121_v7 = vand.u32 127, %v51_v5  ;;  %v1128_v10 = vld [vmem:[%s1606_s1 + $0x8] sm:$0xff] }
   0x3   :  { %s984_s18 = smov 112   ;;  %s986_s19 = smov 111   ;;  %v1141_v15 = vld [vmem:[%s1606_s1] sm:$0xff]  ;;  %v1158_v24 = vld [vmem:[%s1606_s1 + $0x10] sm:$0xff]  ;;  %v1163_v25 = vld [vmem:[%s1606_s1 + $0x18] sm:$0xff] }
   0x4   :  { %v93_v8 = vsub.s32 1, %v1119_v6  ;;  %v60_v9 = vsub.s32 0, %v1119_v6  ;;  %vm86_vm0 = vcmp.lt.s32.totalorder %v1121_v7, 16  ;;  %vm53_vm1 = vcmp.lt.s32.totalorder %v1121_v7, 17 }
   0x5   :  { %v126_v40 = vsub.s32 2, %v1119_v6  ;;  %v159_v41 = vsub.s32 3, %v1119_v6  ;;  %vm119_vm2 = vcmp.lt.s32.totalorder %v1121_v7, 15  ;;  %vm152_vm3 = vcmp.lt.s32.totalorder %v1121_v7, 1 }
   0x6   :  { %80 = vrot.lane.b32.xlu1 %v1045_v1, %s978_s29  ;;  %45 = vrot.lane.b32.xlu0 %v1045_v1, %s979_s30  ;;  %v1133_v13 = vrot.slane %v1128_v10, %v60_v9  ;;  %v1136_v14 = vrot.slane %v1128_v10, %v93_v8  ;;  %v1148_v20 = vrot.slane %v1141_v15, %v93_v8  ;;  %v179_v5 = vsub.s32 4, %v1119_v6 }
   0x7   :  { %v1151_v21 = vrot.slane %v1141_v15, %v60_v9  ;;  %v1170_v31 = vrot.slane %v1158_v24, %v93_v8  ;;  %v1173_v32 = vrot.slane %v1158_v24, %v60_v9  ;;  %v1178_v35 = vrot.slane %v1163_v25, %v60_v9 }
   0x8   :  { %v1181_v36 = vrot.slane %v1163_v25, %v93_v8  ;;  %v1199_v54 = vrot.slane %v1128_v10, %v126_v40  ;;  %v1203_v55 = vrot.slane %v1128_v10, %v159_v41  ;;  %v1212_v62 = vrot.slane %v1141_v15, %v159_v41 }
   0x9   :  { %v1215_v63 = vrot.slane %v1141_v15, %v126_v40  ;;  %vm205_vm4 = vcmp.lt.s32.totalorder %v1121_v7, 127  ;;  %vm238_vm5 = vcmp.lt.s32.totalorder %v1121_v7, 113  ;;  %vm271_vm6 = vcmp.lt.s32.totalorder %v1121_v7, 112 }
   0xa   :  { %84 = vrot.lane.b32.xlu1 %v1054_v2, %s978_s29  ;;  %49 = vrot.lane.b32.xlu0 %v1054_v2, %s979_s30  ;;  %vm304_vm7 = vcmp.lt.s32.totalorder %v1121_v7, 111 }
   0xe   :  { %82 = vrot.lane.b32.xlu1 %v1063_v3, %s978_s29  ;;  %47 = vrot.lane.b32.xlu0 %v1063_v3, %s979_s30 }
  0x12   :  { %113 = vrot.lane.b32.xlu1 %v1045_v1, %s980_s15  ;;  %111 = vrot.lane.b32.xlu0 %v1036_v0, %s980_s15 }
  0x16   :  { %146 = vrot.lane.b32.xlu1 %v1045_v1, %s981_s16  ;;  %144 = vrot.lane.b32.xlu0 %v1036_v0, %s981_s16 }
  0x1a   :  { %150 = vrot.lane.b32.xlu1 %v1054_v2, %s981_s16  ;;  %117 = vrot.lane.b32.xlu0 %v1054_v2, %s980_s15 }
  0x1e   :  { %148 = vrot.lane.b32.xlu1 %v1063_v3, %s981_s16  ;;  %115 = vrot.lane.b32.xlu0 %v1063_v3, %s980_s15 }
  0x22   :  { %201 = vrot.lane.b32.xlu1 %v1063_v3, %s982_s0  ;;  %199 = vrot.lane.b32.xlu0 %v1045_v1, %s982_s0 }
  0x26   :  { %203 = vrot.lane.b32.xlu1 %v1054_v2, %s982_s0  ;;  %197 = vrot.lane.b32.xlu0 %v1036_v0, %s982_s0 }
  0x2a   :  { %234 = vrot.lane.b32.xlu1 %v1063_v3, %s983_s17  ;;  %232 = vrot.lane.b32.xlu0 %v1045_v1, %s983_s17 }
  0x2e   :  { %267 = vrot.lane.b32.xlu1 %v1063_v3, %s984_s18  ;;  %265 = vrot.lane.b32.xlu0 %v1045_v1, %s984_s18 }
  0x32   :  { %263 = vrot.lane.b32.xlu1 %v1036_v0, %s984_s18  ;;  %230 = vrot.lane.b32.xlu0 %v1036_v0, %s983_s17 }
  0x36   :  { %269 = vrot.lane.b32.xlu1 %v1054_v2, %s984_s18  ;;  %236 = vrot.lane.b32.xlu0 %v1054_v2, %s983_s17 }
  0x3a   :  { %300 = vrot.lane.b32.xlu1 %v1063_v3, %s986_s19  ;;  %298 = vrot.lane.b32.xlu0 %v1045_v1, %s986_s19 }
  0x3e   :  { %302 = vrot.lane.b32.xlu1 %v1054_v2, %s986_s19  ;;  %296 = vrot.lane.b32.xlu0 %v1036_v0, %s986_s19 }
  0x74   :  { %v79_v11 = vpop.permute.xlu1 %78  ;;  %v44_v12 = vpop.permute.xlu0 %43 }
  0x78   :  { %v81_v16 = vpop.permute.xlu1 %80  ;;  %v46_v17 = vpop.permute.xlu0 %45 }
  0x79   :  { %v89_v18 = vsel %vm86_vm0, %v79_v11, %v81_v16  ;;  %v56_v19 = vsel %vm53_vm1, %v44_v12, %v46_v17 }
  0x7a   :  { %v75_v22 = vmul.f32 %v1133_v13, %v56_v19  ;;  %v108_v23 = vmul.f32 %v1136_v14, %v89_v18  ;;  %v1224_v18 = vrot.slane %v1158_v24, %v159_v41  ;;  %v1227_v19 = vrot.slane %v1163_v25, %v159_v41 }
  0x7c   :  { %v85_v26 = vpop.permute.xlu1 %84  ;;  %v50_v27 = vpop.permute.xlu0 %49  ;;  %v898_v28 = vpack.c.bf16 %v108_v23, %v75_v22 }
  0x7d   :  { %v90_v29 = vsel %vm86_vm0, %v85_v26, %v79_v11  ;;  %v57_v30 = vsel %vm53_vm1, %v50_v27, %v44_v12  ;;  %v212_v12 = vsub.s32 5, %v1119_v6 }
  0x7e   :  { %v107_v33 = vmul.f32 %v1148_v20, %v90_v29  ;;  %v74_v34 = vmul.f32 %v1151_v21, %v57_v30  ;;  %899 = vmatprep.subr.bf16.mxu0 %v898_v28  ;;  %v1238_v28 = vrot.slane %v1128_v10, %v179_v5 }
  0x80   :  { %v83_v37 = vpop.permute.xlu1 %82  ;;  %v48_v38 = vpop.permute.xlu0 %47  ;;  %v900_v39 = vpack.c.bf16 %v107_v33, %v74_v34  ;;  %v1242_v34 = vrot.slane %v1128_v10, %v212_v12 }
  0x81   :  { %v87_v42 = vsel %vm86_vm0, %v83_v37, %v85_v26  ;;  %v88_v43 = vsel %vm86_vm0, %v81_v16, %v83_v37  ;;  %v54_v44 = vsel %vm53_vm1, %v48_v38, %v50_v27  ;;  %v55_v45 = vsel %vm53_vm1, %v46_v17, %v48_v38 }
  0x82   :  { %v109_v46 = vmul.f32 %v1170_v31, %v88_v43  ;;  %v76_v47 = vmul.f32 %v1173_v32, %v55_v45  ;;  %901 = vmatpush1.bf16.msra.mxu0 %v900_v39  ;;  %v77_v48 = vmul.f32 %v1178_v35, %v54_v44  ;;  %v110_v49 = vmul.f32 %v1181_v36, %v87_v42 }
  0x83   :  { %v1232_v26 = vrot.slane %v1158_v24, %v126_v40  ;;  %v1235_v27 = vrot.slane %v1163_v25, %v126_v40  ;;  %v194_v45 = vmul.f32 %v1238_v28, %v1045_v1  ;;  %v1271_v1 = vrot.slane %v1158_v24, %v212_v12 }
  0x84   :  { %v114_v50 = vpop.permute.xlu1 %113  ;;  %v112_v51 = vpop.permute.xlu0 %111  ;;  %v914_v52 = vpack.c.bf16 %v110_v49, %v77_v48  ;;  %v916_v53 = vpack.c.bf16 %v109_v46, %v76_v47  ;;  %v1259_v46 = vrot.slane %v1141_v15, %v179_v5 }
  0x85   :  { %v122_v56 = vsel %vm119_vm2, %v112_v51, %v114_v50 }
  0x86   :  { %915 = vmatprep.subr.bf16.mxu1 %v914_v52  ;;  %v141_v60 = vmul.f32 %v1199_v54, %v122_v56  ;;  %v1265_v52 = vrot.slane %v1158_v24, %v179_v5 }
  0x87   :  { %917 = vmatpush1.bf16.msra.mxu1 %v916_v53 }
  0x88   :  { %v147_v57 = vpop.permute.xlu1 %146  ;;  %v145_v58 = vpop.permute.xlu0 %144 }
  0x89   :  { %v155_v59 = vsel %vm152_vm3, %v145_v58, %v147_v57 }
  0x8a   :  { %v174_v61 = vmul.f32 %v1203_v55, %v155_v59 }
  0x8c   :  { %v151_v8 = vpop.permute.xlu1 %150  ;;  %v118_v9 = vpop.permute.xlu0 %117  ;;  %v902_v11 = vpack.c.bf16 %v174_v61, %v141_v60 }
  0x8d   :  { %v156_v16 = vsel %vm152_vm3, %v151_v8, %v145_v58  ;;  %v123_v17 = vsel %vm119_vm2, %v118_v9, %v112_v51  ;;  %v1277_v58 = vrot.slane %v1163_v25, %v212_v12 }
  0x8e   :  { %v173_v22 = vmul.f32 %v1212_v62, %v156_v16  ;;  %v140_v23 = vmul.f32 %v1215_v63, %v123_v17  ;;  %903 = vmatprep.subr.bf16.mxu0 %v902_v11  ;;  %v245_v17 = vsub.s32 6, %v1119_v6 }
  0x90   :  { %v149_v29 = vpop.permute.xlu1 %148  ;;  %v116_v30 = vpop.permute.xlu0 %115  ;;  %v904_v33 = vpack.c.bf16 %v173_v22, %v140_v23 }
  0x91   :  { %v153_v37 = vsel %vm152_vm3, %v149_v29, %v151_v8  ;;  %v154_v38 = vsel %vm152_vm3, %v147_v57, %v149_v29  ;;  %v120_v39 = vsel %vm119_vm2, %v116_v30, %v118_v9  ;;  %v121_v40 = vsel %vm119_vm2, %v114_v50, %v116_v30 }
  0x92   :  { %v175_v41 = vmul.f32 %v1224_v18, %v154_v38  ;;  %v176_v42 = vmul.f32 %v1227_v19, %v153_v37  ;;  %v142_v43 = vmul.f32 %v1232_v26, %v121_v40  ;;  %v143_v44 = vmul.f32 %v1235_v27, %v120_v39  ;;  %905 = vmatpush1.bf16.msra.mxu0 %v904_v33 }
  0x93   :  { %v1262_v50 = vrot.slane %v1163_v25, %v179_v5  ;;  %v1274_v57 = vrot.slane %v1141_v15, %v212_v12  ;;  %v193_v5 = vmul.f32 %v1259_v46, %v1036_v0  ;;  %v195_v9 = vmul.f32 %v1063_v3, %v1265_v52 }
  0x94   :  { %v202_v47 = vpop.permute.xlu1 %201  ;;  %v200_v48 = vpop.permute.xlu0 %199  ;;  %v918_v49 = vpack.c.bf16 %v176_v42, %v143_v44  ;;  %v920_v51 = vpack.c.bf16 %v175_v41, %v142_v43  ;;  %v278_v3 = vsub.s32 7, %v1119_v6  ;;  %v1298_v38 = vrot.slane %v1128_v10, %v245_v17 }
  0x95   :  { %v207_v53 = vsel %vm205_vm4, %v200_v48, %v202_v47  ;;  %v196_v8 = vmul.f32 %v1054_v2, %v1262_v50 }
  0x96   :  { %v227_v56 = vmul.f32 %v1242_v34, %v207_v53  ;;  %919 = vmatprep.subr.bf16.mxu1 %v918_v49  ;;  %v1302_v39 = vrot.slane %v1128_v10, %v278_v3 }
  0x97   :  { %921 = vmatpush1.bf16.msra.mxu1 %v920_v51 }
  0x98   :  { %v204_v59 = vpop.permute.xlu1 %203  ;;  %v198_v60 = vpop.permute.xlu0 %197  ;;  %v906_v61 = vpack.c.bf16 %v227_v56, %v194_v45  ;;  %v1311_v45 = vrot.slane %v1141_v15, %v278_v3  ;;  %v1321_v56 = vrot.slane %v1158_v24, %v278_v3 }
  0x99   :  { %v206_v11 = vsel %vm205_vm4, %v202_v47, %v204_v59  ;;  %v208_v12 = vsel %vm205_vm4, %v198_v60, %v200_v48  ;;  %v209_v16 = vsel %vm205_vm4, %v204_v59, %v198_v60  ;;  %v1314_v47 = vrot.slane %v1141_v15, %v245_v17 }
  0x9a   :  { %v228_v22 = vmul.f32 %v1271_v1, %v206_v11  ;;  %v226_v0 = vmul.f32 %v1274_v57, %v208_v12  ;;  %v229_v2 = vmul.f32 %v1277_v58, %v209_v16  ;;  %907 = vmatprep.subr.bf16.mxu0 %v906_v61  ;;  %v1324_v59 = vrot.slane %v1163_v25, %v278_v3  ;;  %v1350_v3 = vld [vmem:[%s1606_s1 + $0x28] ss:$0 sm:$0xff] }
  0x9b   :  { %v1329_v61 = vrot.slane %v1158_v24, %v245_v17 }
  0x9c   :  { %v235_v23 = vpop.permute.xlu1 %234  ;;  %v233_v29 = vpop.permute.xlu0 %232  ;;  %v908_v30 = vpack.c.bf16 %v226_v0, %v193_v5  ;;  %v922_v33 = vpack.c.bf16 %v229_v2, %v196_v8  ;;  %v924_v37 = vpack.c.bf16 %v228_v22, %v195_v9  ;;  %v1332_v5 = vrot.slane %v1163_v25, %v245_v17 }
  0x9d   :  { %v240_v6 = vsel %vm238_vm5, %v233_v29, %v235_v23 }
  0x9e   :  { %909 = vmatpush1.bf16.msra.mxu0 %v908_v30  ;;  %923 = vmatprep.subr.bf16.mxu1 %v922_v33  ;;  %v260_v43 = vmul.f32 %v1298_v38, %v240_v6 }
  0x9f   :  { %925 = vmatpush1.bf16.msra.mxu1 %v924_v37 }
  0xa0   :  { %v268_v40 = vpop.permute.xlu1 %267  ;;  %v266_v41 = vpop.permute.xlu0 %265 }
  0xa1   :  { %v273_v42 = vsel %vm271_vm6, %v266_v41, %v268_v40 }
  0xa2   :  { %v293_v44 = vmul.f32 %v1302_v39, %v273_v42  ;;  %v1368_v42 = vld [vmem:[%s1606_s1 + $0x38] ss:$0 sm:$0xff] }
  0xa4   :  { %v264_v10 = vpop.permute.xlu1 %263  ;;  %v231_v48 = vpop.permute.xlu0 %230  ;;  %v910_v49 = vpack.c.bf16 %v293_v44, %v260_v43 }
  0xa5   :  { %v274_v51 = vsel %vm271_vm6, %v264_v10, %v266_v41  ;;  %v241_v53 = vsel %vm238_vm5, %v231_v48, %v233_v29  ;;  %v1363_v41 = vld [vmem:[%s1606_s1 + $0x20] ss:$0 sm:$0xff] }
  0xa6   :  { %v292_v60 = vmul.f32 %v1311_v45, %v274_v51  ;;  %v259_v15 = vmul.f32 %v1314_v47, %v241_v53  ;;  %911 = vmatprep.subr.bf16.mxu0 %v910_v49 }
  0xa8   :  { %v270_v8 = vpop.permute.xlu1 %269  ;;  %v237_v9 = vpop.permute.xlu0 %236  ;;  %v912_v11 = vpack.c.bf16 %v292_v60, %v259_v15  ;;  %v42_v15 = vld [vmem:[%s1607_s2] sm:$0xf] }
  0xa9   :  { %v272_v12 = vsel %vm271_vm6, %v268_v40, %v270_v8  ;;  %v275_v16 = vsel %vm271_vm6, %v270_v8, %v264_v10  ;;  %v239_v22 = vsel %vm238_vm5, %v235_v23, %v237_v9  ;;  %v242_v24 = vsel %vm238_vm5, %v237_v9, %v231_v48  ;;  %v1358_v40 = vld [vmem:[%s1606_s1 + $0x30] ss:$0 sm:$0xff] }
  0xaa   :  { %v294_v25 = vmul.f32 %v1321_v56, %v272_v12  ;;  %v295_v17 = vmul.f32 %v1324_v59, %v275_v16  ;;  %v261_v0 = vmul.f32 %v1329_v61, %v239_v22  ;;  %v262_v2 = vmul.f32 %v1332_v5, %v242_v24  ;;  %913 = vmatpush1.bf16.msra.mxu0 %v912_v11 }
  0xac   :  { %v301_v29 = vpop.permute.xlu1 %300  ;;  %v299_v30 = vpop.permute.xlu0 %298  ;;  %v926_v23 = vpack.c.bf16 %v295_v17, %v262_v2  ;;  %v928_v33 = vpack.c.bf16 %v294_v25, %v261_v0 }
  0xad   :  { %v306_v37 = vsel %vm304_vm7, %v299_v30, %v301_v29 }
  0xae   :  { %v326_v6 = vmul.f32 %v1350_v3, %v306_v37  ;;  %927 = vmatprep.subr.bf16.mxu1 %v926_v23 }
  0xaf   :  { %929 = vmatpush1.bf16.msra.mxu1 %v928_v33 }
  0xb0   :  { %v303_v43 = vpop.permute.xlu1 %302  ;;  %v297_v44 = vpop.permute.xlu0 %296  ;;  %349 = vmatprep.subr.mxu0 %v326_v6 }
  0xb1   :  { %v305_v10 = vsel %vm304_vm7, %v301_v29, %v303_v43  ;;  %v307_v48 = vsel %vm304_vm7, %v297_v44, %v299_v30  ;;  %v308_v49 = vsel %vm304_vm7, %v303_v43, %v297_v44 }
  0xb2   :  { %v327_v51 = vmul.f32 %v1358_v40, %v305_v10  ;;  %v325_v53 = vmul.f32 %v1363_v41, %v307_v48  ;;  %v328_v60 = vmul.f32 %v1368_v42, %v308_v49 }
  0xb4   :  { %350 = vmatpush1.msra.mxu0 %v325_v53  ;;  %420 = vmatprep.subr.mxu1 %v328_v60 }
  0xb5   :  { %893 = vmatmul.mubr.msk.f32.vlgmr.msra.gmra.mrb[0].mxu0 %vm329_vm8, %v42_v15  ;;  %421 = vmatpush1.msra.mxu1 %v327_v51 }
  0xb6   :  { %894 = vmatmul.mubr.msk.f32.vlgmr.msra.gmra.mrb[0].mxu1 %vm329_vm8, %v42_v15  ;;  %737 = vmatprep.mubr.f32.mxu0 %v985_v4 }
  0xb7   :  { %808 = vmatprep.mubr.f32.mxu1 %v985_v4 }
 0x188   :  { %v399_v8 = vpop.f32.mrb[0].mxu0 }
 0x189   :  { %v478_v9 = vsel %vm477_vm9, %v399_v8, 0.0  ;;  %v401_v11 = vpop.f32.mrb[1].mxu0  ;;  %v470_v12 = vpop.f32.mrb[0].mxu1 }
 0x18a   :  { %v479_v16 = vsel %vm477_vm9, %v401_v11, 0.0  ;;  %v481_v22 = vsel %vm477_vm9, %v470_v12, 0.0  ;;  %v472_v24 = vpop.f32.mrb[1].mxu1 }
 0x18b   :  { %v480_v25 = vadd.f32 %v479_v16, %v478_v9  ;;  %v483_v0 = vsel %vm477_vm9, %v472_v24, 0.0  ;;  %v987_v16 = vmov 0  }
 0x18c   :  { %972 = vset.pattern.permute.xlu0 %v987_v16  ;;  %973 = vset.pattern.permute.xlu1 %v987_v16 }
 0x18d   :  { %v482_v17 = vadd.f32 %v481_v22, %v480_v25 }
 0x18f   :  { %v484_v2 = vadd.f32 %v483_v0, %v482_v17  ;;  %v475_v0 = vld [vmem:[%s1608_s4] sm:$0xf] }
 0x191   :  { %485 = vadd.xlane.f32.xlu0 %v484_v2 }
 0x21e   :  { %v486_v29 = vpop.xlane.xlu0 %485 }
 0x21f   :  { %v487_v30 = vmul.f32 0.001953125, %v486_v29 }
 0x221   :  { %v488_v4 = vsub.f32 %v399_v8, %v487_v30  ;;  %v489_v23 = vsub.f32 %v401_v11, %v487_v30  ;;  %v490_v33 = vsub.f32 %v470_v12, %v487_v30  ;;  %v491_v37 = vsub.f32 %v472_v24, %v487_v30 }
 0x223   :  { %v492_v6 = vmul.f32 %v488_v4, %v488_v4  ;;  %v493_v43 = vmul.f32 %v489_v23, %v489_v23  ;;  %v494_v44 = vmul.f32 %v490_v33, %v490_v33  ;;  %v495_v10 = vmul.f32 %v491_v37, %v491_v37  ;;  %v476_v4 = vld [vmem:[%s1609_s5] sm:$0xf] }
 0x225   :  { %v496_v48 = vsel %vm477_vm9, %v492_v6, 0.0  ;;  %v497_v49 = vsel %vm477_vm9, %v493_v43, 0.0  ;;  %v499_v53 = vsel %vm477_vm9, %v494_v44, 0.0  ;;  %v501_v15 = vsel %vm477_vm9, %v495_v10, 0.0 }
 0x226   :  { %v498_v51 = vadd.f32 %v497_v49, %v496_v48 }
 0x228   :  { %v500_v60 = vadd.f32 %v499_v53, %v498_v51 }
 0x22a   :  { %v502_v9 = vadd.f32 %v501_v15, %v500_v60 }
 0x22c   :  { %503 = vadd.xlane.f32.xlu1 %v502_v9 }
 0x2b9   :  { %v504_v22 = vpop.xlane.xlu1 %503 }
 0x2ba   :  { %v505_v25 = vmul.f32 0.001953125, %v504_v22 }
 0x2bc   :  { %v506_v17 = vadd.f32 1e-05, %v505_v25 }
 0x2be   :  { %974 = vrsqrt.f32 %v506_v17 }
 0x2c8   :  { %v975_v2 = vpop.eup %974 }
 0x2c9   :  { %v508_v29 = vmul.f32 %v975_v2, %v475_v0 }
 0x2cb   :  { %513 = vperm.xlu0 %972, %v508_v29   ;;  %v509_v23 = vmul.f32 %v508_v29, %v487_v30 }
 0x2cd   :  { %v510_v33 = vsub.f32 %v476_v4, %v509_v23 }
 0x2cf   :  { %522 = vperm.xlu1 %973, %v510_v33  }
 0x34a   :  { %v514_v37 = vpop.permute.xlu0 %513 }
 0x34b   :  { %v516_v6 = vmul.f32 %v514_v37, %v399_v8  ;;  %v517_v43 = vmul.f32 %v514_v37, %v401_v11  ;;  %v518_v44 = vmul.f32 %v514_v37, %v470_v12  ;;  %v519_v8 = vmul.f32 %v514_v37, %v472_v24 }
 0x34e   :  { %v523_v10 = vpop.permute.xlu1 %522 }
 0x34f   :  { %v525_v48 = vadd.f32 %v523_v10, %v516_v6  ;;  %v526_v49 = vadd.f32 %v523_v10, %v517_v43  ;;  %v527_v51 = vadd.f32 %v523_v10, %v518_v44  ;;  %v528_v11 = vadd.f32 %v523_v10, %v519_v8 }
 0x351   :  { %v529_v53 = vmax.f32 %v525_v48, 0.0  ;;  %v531_v60 = vmax.f32 %v527_v51, 0.0  ;;  %v530_v15 = vmax.f32 %v526_v49, 0.0  ;;  %v532_v30 = vmax.f32 %v528_v11, 0.0 }
 0x353   :  { %v1401_v9 = vsel %vm477_vm9, %v529_v53, 0.0  ;;  %v1404_v16 = vsel %vm477_vm9, %v531_v60, 0.0  ;;  %v1411_v12 = vsel %vm477_vm9, %v530_v15, 0.0  ;;  %v1422_v22 = vsel %vm477_vm9, %v532_v30, 0.0 }
 0x354   :  { %542 = vrot.lane.b32.xlu0 %v1404_v16, %s979_s30  ;;  %538 = vrot.lane.b32.xlu1 %v1401_v9, %s979_s30 }
 0x358   :  { %570 = vrot.lane.b32.xlu0 %v1401_v9, %s980_s15  ;;  %540 = vrot.lane.b32.xlu1 %v1411_v12, %s979_s30 }
 0x35c   :  { %586 = vrot.lane.b32.xlu0 %v1401_v9, %s981_s16  ;;  %554 = vrot.lane.b32.xlu1 %v1401_v9, %s978_s29 }
 0x360   :  { %576 = vrot.lane.b32.xlu0 %v1422_v22, %s980_s15  ;;  %556 = vrot.lane.b32.xlu1 %v1411_v12, %s978_s29 }
 0x364   :  { %574 = vrot.lane.b32.xlu0 %v1404_v16, %s980_s15  ;;  %544 = vrot.lane.b32.xlu1 %v1422_v22, %s979_s30 }
 0x368   :  { %608 = vrot.lane.b32.xlu0 %v1411_v12, %s982_s0  ;;  %560 = vrot.lane.b32.xlu1 %v1422_v22, %s978_s29 }
 0x36c   :  { %606 = vrot.lane.b32.xlu0 %v1401_v9, %s982_s0  ;;  %558 = vrot.lane.b32.xlu1 %v1404_v16, %s978_s29 }
 0x370   :  { %624 = vrot.lane.b32.xlu0 %v1411_v12, %s983_s17  ;;  %572 = vrot.lane.b32.xlu1 %v1411_v12, %s980_s15 }
 0x374   :  { %640 = vrot.lane.b32.xlu0 %v1411_v12, %s984_s18  ;;  %588 = vrot.lane.b32.xlu1 %v1411_v12, %s981_s16 }
 0x378   :  { %622 = vrot.lane.b32.xlu0 %v1401_v9, %s983_s17  ;;  %592 = vrot.lane.b32.xlu1 %v1422_v22, %s981_s16 }
 0x37c   :  { %628 = vrot.lane.b32.xlu0 %v1422_v22, %s983_s17  ;;  %590 = vrot.lane.b32.xlu1 %v1404_v16, %s981_s16 }
 0x380   :  { %656 = vrot.lane.b32.xlu0 %v1411_v12, %s986_s19  ;;  %610 = vrot.lane.b32.xlu1 %v1404_v16, %s982_s0 }
 0x384   :  { %654 = vrot.lane.b32.xlu0 %v1401_v9, %s986_s19  ;;  %612 = vrot.lane.b32.xlu1 %v1422_v22, %s982_s0 }
 0x388   :  { %626 = vrot.lane.b32.xlu1 %v1404_v16, %s983_s17 }
 0x38c   :  { %642 = vrot.lane.b32.xlu1 %v1404_v16, %s984_s18 }
 0x390   :  { %638 = vrot.lane.b32.xlu1 %v1401_v9, %s984_s18 }
 0x394   :  { %644 = vrot.lane.b32.xlu1 %v1422_v22, %s984_s18 }
 0x398   :  { %658 = vrot.lane.b32.xlu1 %v1404_v16, %s986_s19 }
 0x39c   :  { %660 = vrot.lane.b32.xlu1 %v1422_v22, %s986_s19 }
 0x3c6   :  { %v543_v24 = vpop.permute.xlu0 %542  ;;  %v539_v25 = vpop.permute.xlu1 %538 }
 0x3ca   :  { %v571_v17 = vpop.permute.xlu0 %570  ;;  %v541_v0 = vpop.permute.xlu1 %540 }
 0x3cb   :  { %v548_v4 = vsel %vm53_vm1, %v539_v25, %v541_v0 }
 0x3cc   :  { %v551_v6 = vmul.f32 %v548_v4, %v1133_v13  ;;  %v547_v13 = vsel %vm53_vm1, %v541_v0, %v543_v24 }
 0x3ce   :  { %v587_v2 = vpop.permute.xlu0 %586  ;;  %v555_v29 = vpop.permute.xlu1 %554 }
 0x3d2   :  { %v577_v23 = vpop.permute.xlu0 %576  ;;  %v557_v33 = vpop.permute.xlu1 %556 }
 0x3d3   :  { %v564_v37 = vsel %vm86_vm0, %v555_v29, %v557_v33 }
 0x3d4   :  { %v567_v43 = vmul.f32 %v564_v37, %v1136_v14 }
 0x3d6   :  { %v545_v44 = vpop.permute.xlu1 %544  ;;  %v930_v10 = vpack.c.bf16 %v567_v43, %v551_v6  ;;  %v575_v48 = vpop.permute.xlu0 %574 }
 0x3d7   :  { %v549_v49 = vsel %vm53_vm1, %v545_v44, %v539_v25  ;;  %v546_v14 = vsel %vm53_vm1, %v543_v24, %v545_v44 }
 0x3d8   :  { %931 = vmatprep.subr.bf16.mxu0 %v930_v10  ;;  %v550_v60 = vmul.f32 %v549_v49, %v1151_v21  ;;  %v553_v21 = vmul.f32 %v546_v14, %v1178_v35 }
 0x3da   :  { %v561_v51 = vpop.permute.xlu1 %560  ;;  %v609_v8 = vpop.permute.xlu0 %608 }
 0x3db   :  { %v565_v53 = vsel %vm86_vm0, %v561_v51, %v555_v29  ;;  %v552_v29 = vmul.f32 %v547_v13, %v1173_v32 }
 0x3dc   :  { %v566_v15 = vmul.f32 %v565_v53, %v1148_v20 }
 0x3de   :  { %v932_v11 = vpack.c.bf16 %v566_v15, %v550_v60  ;;  %v559_v30 = vpop.permute.xlu1 %558  ;;  %v607_v43 = vpop.permute.xlu0 %606  ;;  %v578_v15 = vsel %vm119_vm2, %v575_v48, %v577_v23 }
 0x3df   :  { %v562_v25 = vsel %vm86_vm0, %v559_v30, %v561_v51  ;;  %v563_v4 = vsel %vm86_vm0, %v557_v33, %v559_v30 }
 0x3e0   :  { %v568_v20 = vmul.f32 %v563_v4, %v1170_v31  ;;  %v569_v0 = vmul.f32 %v562_v25, %v1181_v36  ;;  %933 = vmatpush1.bf16.msra.mxu0 %v932_v11  ;;  %v581_v36 = vsel %vm119_vm2, %v577_v23, %v571_v17 }
 0x3e1   :  { %v582_v60 = vmul.f32 %v581_v36, %v1215_v63 }
 0x3e2   :  { %v948_v37 = vpack.c.bf16 %v568_v20, %v552_v29  ;;  %v573_v24 = vpop.permute.xlu1 %572  ;;  %v946_v6 = vpack.c.bf16 %v569_v0, %v553_v21  ;;  %v625_v33 = vpop.permute.xlu0 %624  ;;  %v603_v0 = vmul.f32 %v1411_v12, %v1238_v28 }
 0x3e3   :  { %v580_v44 = vsel %vm119_vm2, %v571_v17, %v573_v24  ;;  %v585_v17 = vmul.f32 %v578_v15, %v1235_v27 }
 0x3e4   :  { %947 = vmatprep.subr.bf16.mxu1 %v946_v6  ;;  %v583_v35 = vmul.f32 %v580_v44, %v1199_v54  ;;  %v579_v54 = vsel %vm119_vm2, %v573_v24, %v575_v48 }
 0x3e5   :  { %949 = vmatpush1.bf16.msra.mxu1 %v948_v37 }
 0x3e6   :  { %v589_v10 = vpop.permute.xlu1 %588  ;;  %v641_v11 = vpop.permute.xlu0 %640 }
 0x3e7   :  { %v596_v32 = vsel %vm152_vm3, %v587_v2, %v589_v10 }
 0x3e8   :  { %v599_v31 = vmul.f32 %v596_v32, %v1203_v55 }
 0x3ea   :  { %v593_v49 = vpop.permute.xlu1 %592  ;;  %v934_v51 = vpack.c.bf16 %v599_v31, %v583_v35 }
 0x3eb   :  { %v597_v53 = vsel %vm152_vm3, %v593_v49, %v587_v2  ;;  %v616_v2 = vsel %vm205_vm4, %v607_v43, %v609_v8 }
 0x3ec   :  { %v598_v13 = vmul.f32 %v597_v53, %v1212_v62  ;;  %935 = vmatprep.subr.bf16.mxu0 %v934_v51  ;;  %v584_v62 = vmul.f32 %v579_v54, %v1232_v26  ;;  %v618_v29 = vmul.f32 %v616_v2, %v1274_v57  ;;  %v623_v26 = vpop.permute.xlu0 %622 }
 0x3ee   :  { %v936_v55 = vpack.c.bf16 %v598_v13, %v582_v60  ;;  %v591_v14 = vpop.permute.xlu1 %590 }
 0x3ef   :  { %v594_v30 = vsel %vm152_vm3, %v591_v14, %v593_v49  ;;  %v595_v63 = vsel %vm152_vm3, %v589_v10, %v591_v14 }
 0x3f0   :  { %v600_v23 = vmul.f32 %v595_v63, %v1224_v18  ;;  %v601_v48 = vmul.f32 %v594_v30, %v1227_v19  ;;  %937 = vmatpush1.bf16.msra.mxu0 %v936_v55  ;;  %v602_v18 = vmul.f32 %v1401_v9, %v1259_v46  ;;  %v605_v46 = vmul.f32 %v1422_v22, %v1262_v50  ;;  %v629_v10 = vpop.permute.xlu0 %628 }
 0x3f1   :  { %v632_v50 = vsel %vm238_vm5, %v623_v26, %v625_v33  ;;  %v633_v51 = vsel %vm238_vm5, %v629_v10, %v623_v26 }
 0x3f2   :  { %v952_v25 = vpack.c.bf16 %v600_v23, %v584_v62  ;;  %v611_v4 = vpop.permute.xlu1 %610  ;;  %v950_v27 = vpack.c.bf16 %v601_v48, %v585_v17  ;;  %v940_v24 = vpack.c.bf16 %v618_v29, %v602_v18  ;;  %v634_v36 = vmul.f32 %v632_v50, %v1314_v47 }
 0x3f3   :  { %v615_v21 = vsel %vm205_vm4, %v609_v8, %v611_v4  ;;  %v637_v47 = vmul.f32 %v633_v51, %v1332_v5 }
 0x3f4   :  { %v619_v20 = vmul.f32 %v615_v21, %v1242_v34  ;;  %951 = vmatprep.subr.bf16.mxu1 %v950_v27  ;;  %v604_v34 = vmul.f32 %v1404_v16, %v1265_v52  ;;  %v657_v16 = vpop.permute.xlu0 %656 }
 0x3f5   :  { %953 = vmatpush1.bf16.msra.mxu1 %v952_v25 }
 0x3f6   :  { %v613_v19 = vpop.permute.xlu1 %612  ;;  %v938_v37 = vpack.c.bf16 %v619_v20, %v603_v0 }
 0x3f7   :  { %v614_v57 = vsel %vm205_vm4, %v611_v4, %v613_v19  ;;  %v617_v8 = vsel %vm205_vm4, %v613_v19, %v607_v43 }
 0x3f8   :  { %v620_v6 = vmul.f32 %v614_v57, %v1271_v1  ;;  %v621_v28 = vmul.f32 %v617_v8, %v1277_v58  ;;  %939 = vmatprep.subr.bf16.mxu0 %v938_v37 }
 0x3f9   :  { %941 = vmatpush1.bf16.msra.mxu0 %v940_v24 }
 0x3fa   :  { %v956_v9 = vpack.c.bf16 %v620_v6, %v604_v34  ;;  %v627_v12 = vpop.permute.xlu1 %626  ;;  %v954_v44 = vpack.c.bf16 %v621_v28, %v605_v46 }
 0x3fb   :  { %v631_v43 = vsel %vm238_vm5, %v625_v33, %v627_v12  ;;  %v655_v33 = vpop.permute.xlu0 %654 }
 0x3fc   :  { %955 = vmatprep.subr.bf16.mxu1 %v954_v44  ;;  %v635_v1 = vmul.f32 %v631_v43, %v1298_v38  ;;  %v630_v38 = vsel %vm238_vm5, %v627_v12, %v629_v10  ;;  %v664_v55 = vsel %vm304_vm7, %v655_v33, %v657_v16 }
 0x3fd   :  { %957 = vmatpush1.bf16.msra.mxu1 %v956_v9  ;;  %v666_v5 = vmul.f32 %v1363_v41, %v664_v55 }
 0x3fe   :  { %v643_v32 = vpop.permute.xlu1 %642 }
 0x3ff   :  { %v647_v52 = vsel %vm271_vm6, %v641_v11, %v643_v32 }
 0x400   :  { %v651_v58 = vmul.f32 %v647_v52, %v1302_v39 }
 0x402   :  { %v639_v22 = vpop.permute.xlu1 %638  ;;  %v942_v35 = vpack.c.bf16 %v651_v58, %v635_v1  ;;  %v815_v1 = vld [vmem:[%s1611_s6] sm:$0xf] }
 0x403   :  { %v648_v31 = vsel %vm271_vm6, %v639_v22, %v641_v11 }
 0x404   :  { %v650_v49 = vmul.f32 %v648_v31, %v1311_v45  ;;  %943 = vmatprep.subr.bf16.mxu0 %v942_v35  ;;  %v636_v45 = vmul.f32 %v630_v38, %v1329_v61 }
 0x406   :  { %v944_v39 = vpack.c.bf16 %v650_v49, %v634_v36  ;;  %v645_v53 = vpop.permute.xlu1 %644 }
 0x407   :  { %v646_v60 = vsel %vm271_vm6, %v643_v32, %v645_v53  ;;  %v649_v15 = vsel %vm271_vm6, %v645_v53, %v639_v22 }
 0x408   :  { %v652_v13 = vmul.f32 %v646_v60, %v1321_v56  ;;  %v653_v54 = vmul.f32 %v649_v15, %v1324_v59  ;;  %945 = vmatpush1.bf16.msra.mxu0 %v944_v39  ;;  %v537_v56 = vld [vmem:[%s1610_s3] sm:$0xf] }
 0x40a   :  { %v960_v14 = vpack.c.bf16 %v652_v13, %v636_v45  ;;  %v659_v17 = vpop.permute.xlu1 %658  ;;  %v958_v11 = vpack.c.bf16 %v653_v54, %v637_v47 }
 0x40b   :  { %v663_v30 = vsel %vm304_vm7, %v657_v16, %v659_v17  ;;  %v816_v16 = vld [vmem:[%s1612_s7] sm:$0xf] }
 0x40c   :  { %v667_v63 = vmul.f32 %v1350_v3, %v663_v30  ;;  %959 = vmatprep.subr.bf16.mxu1 %v958_v11 }
 0x40d   :  { %961 = vmatpush1.bf16.msra.mxu1 %v960_v14 }
 0x40e   :  { %v661_v59 = vpop.permute.xlu1 %660  ;;  %689 = vmatprep.subr.mxu0 %v667_v63 }
 0x40f   :  { %v662_v61 = vsel %vm304_vm7, %v659_v17, %v661_v59  ;;  %v665_v2 = vsel %vm304_vm7, %v661_v59, %v655_v33  ;;  %690 = vmatpush1.msra.mxu0 %v666_v5 }
 0x410   :  { %v668_v62 = vmul.f32 %v1358_v40, %v662_v61  ;;  %v669_v3 = vmul.f32 %v1368_v42, %v665_v2  ;;  %895 = vmatmul.mubr.msk.f32.vlgmr.msra.gmra.mrb[2].mxu0 %vm329_vm8, %v537_v56 }
 0x412   :  { %760 = vmatprep.subr.mxu1 %v669_v3 }
 0x413   :  { %761 = vmatpush1.msra.mxu1 %v668_v62 }
 0x414   :  { %896 = vmatmul.mubr.msk.f32.vlgmr.msra.gmra.mrb[2].mxu1 %vm329_vm8, %v537_v56 }
 0x4e3   :  { %v739_v41 = vpop.f32.mrb[2].mxu0 }
 0x4e4   :  { %v817_v23 = vsel %vm477_vm9, %v739_v41, 0.0  ;;  %v741_v48 = vpop.f32.mrb[3].mxu0 }
 0x4e5   :  { %v818_v25 = vsel %vm477_vm9, %v741_v48, 0.0 }
 0x4e6   :  { %v819_v4 = vadd.f32 %v818_v25, %v817_v23 }
 0x4e7   :  { %v810_v7 = vpop.f32.mrb[2].mxu1 }
 0x4e8   :  { %v820_v27 = vsel %vm477_vm9, %v810_v7, 0.0  ;;  %v812_v29 = vpop.f32.mrb[3].mxu1 }
 0x4e9   :  { %v822_v40 = vsel %vm477_vm9, %v812_v29, 0.0  ;;  %v821_v42 = vadd.f32 %v820_v27, %v819_v4 }
 0x4eb   :  { %v823_v21 = vadd.f32 %v822_v40, %v821_v42 }
 0x4ed   :  { %824 = vadd.xlane.f32.xlu0 %v823_v21 }
 0x57a   :  { %v825_v20 = vpop.xlane.xlu0 %824 }
 0x57b   :  { %v826_v0 = vmul.f32 0.001953125, %v825_v20 }
 0x57d   :  { %v827_v18 = vsub.f32 %v739_v41, %v826_v0  ;;  %v828_v26 = vsub.f32 %v741_v48, %v826_v0  ;;  %v829_v19 = vsub.f32 %v810_v7, %v826_v0  ;;  %v830_v37 = vsub.f32 %v812_v29, %v826_v0 }
 0x57f   :  { %v831_v24 = vmul.f32 %v827_v18, %v827_v18  ;;  %v832_v57 = vmul.f32 %v828_v26, %v828_v26  ;;  %v833_v8 = vmul.f32 %v829_v19, %v829_v19  ;;  %v834_v34 = vmul.f32 %v830_v37, %v830_v37 }
 0x581   :  { %v835_v6 = vsel %vm477_vm9, %v831_v24, 0.0  ;;  %v836_v28 = vsel %vm477_vm9, %v832_v57, 0.0  ;;  %v838_v9 = vsel %vm477_vm9, %v833_v8, 0.0  ;;  %v840_v44 = vsel %vm477_vm9, %v834_v34, 0.0 }
 0x582   :  { %v837_v46 = vadd.f32 %v836_v28, %v835_v6 }
 0x584   :  { %v839_v12 = vadd.f32 %v838_v9, %v837_v46 }
 0x586   :  { %v841_v10 = vadd.f32 %v840_v44, %v839_v12 }
 0x588   :  { %842 = vadd.xlane.f32.xlu1 %v841_v10 }
 0x615   :  { %v843_v43 = vpop.xlane.xlu1 %842 }
 0x616   :  { %v844_v32 = vmul.f32 0.001953125, %v843_v43 }
 0x618   :  { %v845_v52 = vadd.f32 1e-05, %v844_v32 }
 0x61a   :  { %976 = vrsqrt.f32 %v845_v52 }
 0x624   :  { %v977_v58 = vpop.eup %976 }
 0x625   :  { %v847_v50 = vmul.f32 %v977_v58, %v815_v1 }
 0x627   :  { %852 = vperm.xlu0 %972, %v847_v50   ;;  %v848_v22 = vmul.f32 %v847_v50, %v826_v0 }
 0x629   :  { %v849_v35 = vsub.f32 %v816_v16, %v848_v22 }
 0x62b   :  { %861 = vperm.xlu1 %973, %v849_v35  }
 0x6a6   :  { %v853_v31 = vpop.permute.xlu0 %852 }
 0x6a7   :  { %v855_v36 = vmul.f32 %v853_v31, %v739_v41  ;;  %v856_v49 = vmul.f32 %v853_v31, %v741_v48  ;;  %v857_v51 = vmul.f32 %v853_v31, %v810_v7  ;;  %v858_v38 = vmul.f32 %v853_v31, %v812_v29 }
 0x6aa   :  { %v862_v39 = vpop.permute.xlu1 %861 }
 0x6ab   :  { %v864_v53 = vadd.f32 %v862_v39, %v855_v36  ;;  %v865_v33 = vadd.f32 %v862_v39, %v856_v49  ;;  %v866_v60 = vadd.f32 %v862_v39, %v857_v51  ;;  %v867_v15 = vadd.f32 %v862_v39, %v858_v38 }
 0x6ad   :  { %v868_v47 = vmax.f32 %v864_v53, 0.0  ;;  %v869_v45 = vmax.f32 %v865_v33, 0.0  ;;  %v870_v13 = vmax.f32 %v866_v60, 0.0  ;;  %v871_v54 = vmax.f32 %v867_v15, 0.0 }
 0x6af   :  { %v874_v55 = vcombine.low %v868_v47, %v869_v45  ;;  %v879_v14 = vcombine.low %v870_v13, %v871_v54 }
 0x6b1   :  { %876 = vst [vmem:[%s1613_s8] sm:$0xff] %v874_v55  ;;  %897 = vst [vmem:[%s1613_s8 + $0x8] sm:$0xff] %v879_v14 }

</bundles_post_ra>
